<compile_context>
chip_gen: v7x
topology: tpu7x:2x2x1
jax: 0.10.0
libtpu: 0.0.40
codegen_flags: <defaults>
</compile_context>

<pallas_src>
import functools

import numpy as np
import jax
import jax.numpy as jnp
from jax.experimental import pallas as pl
from jax.experimental.pallas import tpu as pltpu


# ----------------------------- Pallas kernel ------------------------------

def make_mlp_kernel(num_hidden):
    """Kernel over one batch tile, batch-on-lanes layout.

    refs = (x_ref, w1, b1, ..., wN, bN, wo, bo, out_ref)
      x_ref : (D, TB)      bf16   input tile, batch on lanes
      wi    : (H_i, D_i)   bf16   folded (Linear+BN) weight, pre-transposed
      bi    : (H_i, 1)     f32    folded (Linear+BN) bias
      wo    : (1, H_last)  f32    output Linear weight (row layout)
      bo    : (1, 1)       f32    output Linear bias (SMEM scalar)
      out   : (1, TB)      f32    lane-dense output slab
    """

    def kernel(*refs):
        x_ref = refs[0]
        out_ref = refs[-1]
        wb_refs = refs[1:1 + 2 * num_hidden]
        wo_ref = refs[1 + 2 * num_hidden]
        bo_ref = refs[2 + 2 * num_hidden]

        h = x_ref[...]                                   # bf16 (D, TB)
        for l in range(num_hidden):                      # static unroll (few layers)
            wt = wb_refs[2 * l][...]                     # bf16 (H_l, D_l)
            bt = wb_refs[2 * l + 1][...]                 # f32  (H_l, 1)
            # MXU matmul, bf16 operands, f32 accumulation; N = TB (lane-dense).
            a = jnp.dot(wt, h.astype(wt.dtype),
                        preferred_element_type=jnp.float32) + bt
            h = jnp.maximum(a, 0.0)                      # ReLU (VPU, f32)
            # Dropout (eval mode) == identity.

        # Output Linear(H_last, 1): (1, H) @ (H, TB) -> (1, TB): a regular MXU
        # matmul with a lane-dense result (no masked store, no XLU lane reduction).
        out_ref[...] = (jnp.dot(wo_ref[...], h, preferred_element_type=jnp.float32)
                        + bo_ref[0, 0])

    return kernel


# ------------------------------- wrapper -----------------------------------

def _round_up(x, m):
    return ((x + m - 1) // m) * m


def _choose_tile(batch, tile_b):
    """Batch maps to lanes -> tile must be a multiple of 128.  Keep >= 2 grid steps
    whenever the batch allows, so the 'parallel' axis can shard across v7x's 2 TCs."""
    pb = _round_up(batch, 128)
    tb = min(_round_up(tile_b, 128), pb)
    if pb // tb < 2 and pb >= 256:
        tb = _round_up(pb // 2, 128)
    pb = _round_up(batch, tb)
    return tb, pb


def _vmem_bytes_estimate(input_dim, hidden_dims, tb):
    """Generous VMEM upper bound (resident weights + pipelined x/out tiles)."""
    n = 0
    d = input_dim
    for h in hidden_dims:
        n += d * h * 2 + h * 4            # bf16 weight + f32 bias
        d = h
    n += d * 4 + 4                        # f32 output weight + bias
    n *= 2                                # worst case: weights still double-buffered
    n += 2 * tb * input_dim * 2           # x tile, double-buffered bf16
    n += 2 * tb * 4                       # out tile, double-buffered f32
    n += 4 * tb * max([input_dim] + list(hidden_dims)) * 4   # live activations
    return n


def _resident_spec(shape, single_buffer):
    """BlockSpec for a grid-invariant (weight/bias) input kept resident in VMEM."""
    ndim = len(shape)
    index_map = lambda i: (0,) * ndim
    if single_buffer:
        # Constant across grid steps -> no benefit from double-buffering it.
        return pl.BlockSpec(shape, index_map, pipeline_mode=pl.Buffered(1))
    return pl.BlockSpec(shape, index_map)


def mlp_pallas(xt, wts, bts, wo, bo, *, tile_b=1024, single_buffer_weights=True):
    """xt: (D, B) bf16 (batch on lanes); wts/bts: folded + transposed hidden layers;
    wo: (1, H_last) f32; bo: (1, 1) f32.  Returns (B, 1) f32."""
    D, B = xt.shape
    num_hidden = len(wts)
    hidden_dims = [w.shape[0] for w in wts]

    tb, pb = _choose_tile(B, tile_b)
    if pb != B:
        # Padded batch columns are garbage after the bias/ReLU but are sliced off.
        xt = jnp.pad(xt, ((0, 0), (0, pb - B)))

    in_specs = [pl.BlockSpec((D, tb), lambda i: (0, i))]
    args = [xt]
    for wt, bt in zip(wts, bts):
        in_specs.append(_resident_spec(wt.shape, single_buffer_weights))
        args.append(wt)
        in_specs.append(_resident_spec(bt.shape, single_buffer_weights))
        args.append(bt)
    in_specs.append(_resident_spec(wo.shape, single_buffer_weights))
    args.append(wo)
    in_specs.append(pl.BlockSpec(memory_space=pltpu.MemorySpace.SMEM))  # scalar bias
    args.append(bo)

    vmem_limit = int(min(max(4 * _vmem_bytes_estimate(D, hidden_dims, tb),
                             32 * 1024 * 1024),
                         64 * 1024 * 1024))              # stays within v7x's 64 MiB

    out = pl.pallas_call(
        make_mlp_kernel(num_hidden),
        out_shape=jax.ShapeDtypeStruct((1, pb), jnp.float32),
        grid=(pb // tb,),
        in_specs=in_specs,
        out_specs=pl.BlockSpec((1, tb), lambda i: (0, i)),   # lane-dense output slab
        compiler_params=pltpu.CompilerParams(
            dimension_semantics=("parallel",),
            vmem_limit_bytes=vmem_limit),
    )(*args)

    return out[:, :B].T                                      # (B, 1)


@functools.partial(jax.jit, static_argnames=("single_buffer_weights",))
def mlp_forward(x, params, single_buffer_weights=True):
    """Eval-mode forward matching torch MultiLayerPerceptron.forward."""
    eps = 1e-5
    wts, bts = [], []
    for L in params["layers"]:
        # Fold BatchNorm1d (eval, running stats) into the Linear layer:
        #   y = ((x@W + b) - m) * g/sqrt(v+eps) + beta = x@(W*s) + ((b-m)*s + beta)
        scale = L["gamma"] * jax.lax.rsqrt(L["var"] + eps)             # (H,)
        w_f = L["w"] * scale[None, :]                                  # (in, out)
        b_f = (L["b"] - L["mean"]) * scale + L["beta"]                 # (out,)
        wts.append(w_f.T.astype(jnp.bfloat16))                        # (out, in)
        bts.append(b_f[:, None])                                       # (out, 1) f32

    wo = params["out_w"][None, :]                    # (1, H_last) f32
    bo = params["out_b"].reshape(1, 1)               # (1, 1) f32
    xt = x.T.astype(jnp.bfloat16)                    # (D, B): batch on lanes
    return mlp_pallas(xt, wts, bts, wo, bo,
                      single_buffer_weights=single_buffer_weights)


# --------------------------- params / reference ----------------------------

def make_params(input_dim, embed_dims, key):
    layers = []
    d = input_dim
    for h in embed_dims:
        key, k1, k2, k3, k4, k5, k6 = jax.random.split(key, 7)
        lim = 1.0 / float(np.sqrt(d))
        layers.append(dict(
            w=jax.random.uniform(k1, (d, h), jnp.float32, -lim, lim),  # (in, out)
            b=jax.random.uniform(k2, (h,), jnp.float32, -lim, lim),
            gamma=jax.random.uniform(k3, (h,), jnp.float32, 0.9, 1.1),
            beta=jax.random.uniform(k4, (h,), jnp.float32, -0.1, 0.1),
            mean=jax.random.uniform(k5, (h,), jnp.float32, -0.1, 0.1),
            var=jax.random.uniform(k6, (h,), jnp.float32, 0.5, 1.5),
        ))
        d = h
    key, k1, k2 = jax.random.split(key, 3)
    lim = 1.0 / float(np.sqrt(d))
    return dict(
        layers=layers,
        out_w=jax.random.uniform(k1, (d,), jnp.float32, -lim, lim),
        out_b=jax.random.uniform(k2, (), jnp.float32, -lim, lim),
    )


def mlp_reference(x, params):
    """Pure-JAX f32 reference (unfused BN, eval mode)."""
    eps = 1e-5
    h = x
    for L in params["layers"]:
        h = h @ L["w"] + L["b"]
        h = (h - L["mean"]) * jax.lax.rsqrt(L["var"] + eps) * L["gamma"] + L["beta"]
        h = jnp.maximum(h, 0.0)
    return h @ params["out_w"][:, None] + params["out_b"]


# ---------------------------------- main ------------------------------------

if __name__ == "__main__":
    B = 256            # batch (mapped to lanes; tiled by the 1-D parallel grid)
    D = 32             # input_dim
    embed_dims = (64, 32)
    # dropout p is irrelevant in eval mode (identity)

    key = jax.random.PRNGKey(0)
    kp, kx = jax.random.split(key)
    params = make_params(D, embed_dims, kp)
    x = jax.random.normal(kx, (B, D), jnp.float32)

    try:
        out = jax.block_until_ready(mlp_forward(x, params))
    except Exception:
        # Fallback: some JAX versions reject pipeline_mode=pl.Buffered(1);
        # rerun with default (double-buffered) weight BlockSpecs.
        out = jax.block_until_ready(
            mlp_forward(x, params, single_buffer_weights=False))

    assert out.shape == (B, 1)

    ref = mlp_reference(x, params)
    np.testing.assert_allclose(np.asarray(out), np.asarray(ref),
                               rtol=5e-2, atol=5e-2)
    print("KERNEL_OK")
</pallas_src>

<mosaic_0001>
module attributes {stable_mosaic.version = 11 : i64} {
  func.func @kernel(%arg0: i32, %arg1: memref<32x128xbf16, #tpu.memory_space<vmem>>, %arg2: memref<64x32xbf16, #tpu.memory_space<vmem>>, %arg3: memref<64x1xf32, #tpu.memory_space<vmem>>, %arg4: memref<32x64xbf16, #tpu.memory_space<vmem>>, %arg5: memref<32x1xf32, #tpu.memory_space<vmem>>, %arg6: memref<1x32xf32, #tpu.memory_space<vmem>>, %arg7: memref<1x1xf32, #tpu.memory_space<smem>>, %arg8: memref<1x128xf32, #tpu.memory_space<vmem>>) attributes {dimension_semantics = [#tpu.dimension_semantics<parallel>], iteration_bounds = array<i64: 2>, scalar_prefetch = 0 : i64, scratch_operands = 0 : i64, tpu.core_type = #tpu.core_type<tc>, window_params = [{transform_indices = @transform_0, window_bounds = array<i64: 32, 128>}, {pipeline_mode = #tpu.pipeline_mode<synchronous>, transform_indices = @transform_1, window_bounds = array<i64: 64, 32>}, {pipeline_mode = #tpu.pipeline_mode<synchronous>, transform_indices = @transform_2, window_bounds = array<i64: 64, 1>}, {pipeline_mode = #tpu.pipeline_mode<synchronous>, transform_indices = @transform_3, window_bounds = array<i64: 32, 64>}, {pipeline_mode = #tpu.pipeline_mode<synchronous>, transform_indices = @transform_4, window_bounds = array<i64: 32, 1>}, {pipeline_mode = #tpu.pipeline_mode<synchronous>, transform_indices = @transform_5, window_bounds = array<i64: 1, 32>}, {transform_indices = @transform_6, window_bounds = array<i64: 1, 1>}, {transform_indices = @transform_7, window_bounds = array<i64: 1, 128>}]} {
    %c0 = arith.constant 0 : index
    %c0_0 = arith.constant 0 : index
    %0 = vector.load %arg1[%c0, %c0_0] : memref<32x128xbf16, #tpu.memory_space<vmem>>, vector<32x128xbf16>
    %c0_1 = arith.constant 0 : index
    %c0_2 = arith.constant 0 : index
    %1 = vector.load %arg2[%c0_1, %c0_2] : memref<64x32xbf16, #tpu.memory_space<vmem>>, vector<64x32xbf16>
    %c0_3 = arith.constant 0 : index
    %c0_4 = arith.constant 0 : index
    %2 = vector.load %arg3[%c0_3, %c0_4] : memref<64x1xf32, #tpu.memory_space<vmem>>, vector<64x1xf32>
    %cst = arith.constant dense<0.000000e+00> : vector<64x128xf32>
    %3 = tpu.matmul %1, %0, %cst {dimension_numbers = #tpu.dot_dimension_numbers<[1], [0], [0], [1], [0, 0, 1, 1], [], []>} : vector<64x32xbf16>, vector<32x128xbf16>, vector<64x128xf32> -> vector<64x128xf32>
    %4 = vector.broadcast %2 : vector<64x1xf32> to vector<64x128xf32>
    %5 = arith.addf %3, %4 : vector<64x128xf32>
    %cst_5 = arith.constant 0.000000e+00 : f32
    %6 = vector.broadcast %cst_5 : f32 to vector<64x128xf32>
    %7 = arith.maximumf %5, %6 : vector<64x128xf32>
    %c0_6 = arith.constant 0 : index
    %c0_7 = arith.constant 0 : index
    %8 = vector.load %arg4[%c0_6, %c0_7] : memref<32x64xbf16, #tpu.memory_space<vmem>>, vector<32x64xbf16>
    %c0_8 = arith.constant 0 : index
    %c0_9 = arith.constant 0 : index
    %9 = vector.load %arg5[%c0_8, %c0_9] : memref<32x1xf32, #tpu.memory_space<vmem>>, vector<32x1xf32>
    %10 = arith.truncf %7 : vector<64x128xf32> to vector<64x128xbf16>
    %cst_10 = arith.constant dense<0.000000e+00> : vector<32x128xf32>
    %11 = tpu.matmul %8, %10, %cst_10 {dimension_numbers = #tpu.dot_dimension_numbers<[1], [0], [0], [1], [0, 0, 1, 1], [], []>} : vector<32x64xbf16>, vector<64x128xbf16>, vector<32x128xf32> -> vector<32x128xf32>
    %12 = vector.broadcast %9 : vector<32x1xf32> to vector<32x128xf32>
    %13 = arith.addf %11, %12 : vector<32x128xf32>
    %cst_11 = arith.constant 0.000000e+00 : f32
    %14 = vector.broadcast %cst_11 : f32 to vector<32x128xf32>
    %15 = arith.maximumf %13, %14 : vector<32x128xf32>
    %c0_12 = arith.constant 0 : index
    %c0_13 = arith.constant 0 : index
    %16 = vector.load %arg6[%c0_12, %c0_13] : memref<1x32xf32, #tpu.memory_space<vmem>>, vector<1x32xf32>
    %cst_14 = arith.constant dense<0.000000e+00> : vector<1x128xf32>
    %17 = tpu.matmul %16, %15, %cst_14 {dimension_numbers = #tpu.dot_dimension_numbers<[1], [0], [0], [1], [0, 0, 1, 1], [], []>} : vector<1x32xf32>, vector<32x128xf32>, vector<1x128xf32> -> vector<1x128xf32>
    %c0_15 = arith.constant 0 : index
    %c0_16 = arith.constant 0 : index
    %18 = memref.load %arg7[%c0_15, %c0_16] : memref<1x1xf32, #tpu.memory_space<smem>>
    %19 = vector.broadcast %18 : f32 to vector<1x128xf32>
    %20 = arith.addf %17, %19 : vector<1x128xf32>
    %c0_17 = arith.constant 0 : index
    %c0_18 = arith.constant 0 : index
    %21 = vector.load %arg8[%c0_17, %c0_18] : memref<1x128xf32, #tpu.memory_space<vmem>>, vector<1x128xf32>
    tpu.vector_store %arg8[%c0_17, %c0_18], %20 {strides = array<i32>} : memref<1x128xf32, #tpu.memory_space<vmem>>, vector<1x128xf32>,
    return
  }
  func.func @transform_0(%arg0: i32) -> (i32, i32) {
    %c0_i32 = arith.constant 0 : i32
    %c0_i32_0 = arith.constant 0 : i32
    return %c0_i32, %arg0 : i32, i32
  }
  func.func @transform_1(%arg0: i32) -> (i32, i32) {
    %c0_i32 = arith.constant 0 : i32
    %c0_i32_0 = arith.constant 0 : i32
    %c0_i32_1 = arith.constant 0 : i32
    return %c0_i32, %c0_i32_0 : i32, i32
  }
  func.func @transform_2(%arg0: i32) -> (i32, i32) {
    %c0_i32 = arith.constant 0 : i32
    %c0_i32_0 = arith.constant 0 : i32
    %c0_i32_1 = arith.constant 0 : i32
    return %c0_i32, %c0_i32_0 : i32, i32
  }
  func.func @transform_3(%arg0: i32) -> (i32, i32) {
    %c0_i32 = arith.constant 0 : i32
    %c0_i32_0 = arith.constant 0 : i32
    %c0_i32_1 = arith.constant 0 : i32
    return %c0_i32, %c0_i32_0 : i32, i32
  }
  func.func @transform_4(%arg0: i32) -> (i32, i32) {
    %c0_i32 = arith.constant 0 : i32
    %c0_i32_0 = arith.constant 0 : i32
    %c0_i32_1 = arith.constant 0 : i32
    return %c0_i32, %c0_i32_0 : i32, i32
  }
  func.func @transform_5(%arg0: i32) -> (i32, i32) {
    %c0_i32 = arith.constant 0 : i32
    %c0_i32_0 = arith.constant 0 : i32
    %c0_i32_1 = arith.constant 0 : i32
    return %c0_i32, %c0_i32_0 : i32, i32
  }
  func.func @transform_6(%arg0: i32) -> (i32, i32) {
    %c0_i32 = arith.constant 0 : i32
    %c0_i32_0 = arith.constant 0 : i32
    %c0_i32_1 = arith.constant 0 : i32
    return %c0_i32, %c0_i32_0 : i32, i32
  }
  func.func @transform_7(%arg0: i32) -> (i32, i32) {
    %c0_i32 = arith.constant 0 : i32
    %c0_i32_0 = arith.constant 0 : i32
    return %c0_i32, %arg0 : i32, i32
  }
}

module attributes {stable_mosaic.version = 11 : i64} {
  func.func @kernel(%arg0: i32, %arg1: memref<32x128xbf16, #tpu.memory_space<vmem>>, %arg2: memref<64x32xbf16, #tpu.memory_space<vmem>>, %arg3: memref<64x1xf32, #tpu.memory_space<vmem>>, %arg4: memref<32x64xbf16, #tpu.memory_space<vmem>>, %arg5: memref<32x1xf32, #tpu.memory_space<vmem>>, %arg6: memref<1x32xf32, #tpu.memory_space<vmem>>, %arg7: memref<1x1xf32, #tpu.memory_space<smem>>, %arg8: memref<1x128xf32, #tpu.memory_space<vmem>>) attributes {dimension_semantics = [#tpu.dimension_semantics<parallel>], iteration_bounds = array<i64: 2>, scalar_prefetch = 0 : i64, scratch_operands = 0 : i64, tpu.core_type = #tpu.core_type<tc>, window_params = [{transform_indices = @transform_0, window_bounds = array<i64: 32, 128>}, {pipeline_mode = #tpu.pipeline_mode<synchronous>, transform_indices = @transform_1, window_bounds = array<i64: 64, 32>}, {pipeline_mode = #tpu.pipeline_mode<synchronous>, transform_indices = @transform_2, window_bounds = array<i64: 64, 1>}, {pipeline_mode = #tpu.pipeline_mode<synchronous>, transform_indices = @transform_3, window_bounds = array<i64: 32, 64>}, {pipeline_mode = #tpu.pipeline_mode<synchronous>, transform_indices = @transform_4, window_bounds = array<i64: 32, 1>}, {pipeline_mode = #tpu.pipeline_mode<synchronous>, transform_indices = @transform_5, window_bounds = array<i64: 1, 32>}, {transform_indices = @transform_6, window_bounds = array<i64: 1, 1>}, {transform_indices = @transform_7, window_bounds = array<i64: 1, 128>}]} {
    %c0 = arith.constant 0 : index
    %c0_0 = arith.constant 0 : index
    %0 = vector.load %arg1[%c0, %c0_0] : memref<32x128xbf16, #tpu.memory_space<vmem>>, vector<32x128xbf16>
    %c0_1 = arith.constant 0 : index
    %c0_2 = arith.constant 0 : index
    %1 = vector.load %arg2[%c0_1, %c0_2] : memref<64x32xbf16, #tpu.memory_space<vmem>>, vector<64x32xbf16>
    %c0_3 = arith.constant 0 : index
    %c0_4 = arith.constant 0 : index
    %2 = vector.load %arg3[%c0_3, %c0_4] : memref<64x1xf32, #tpu.memory_space<vmem>>, vector<64x1xf32>
    %cst = arith.constant dense<0.000000e+00> : vector<64x128xf32>
    %3 = tpu.matmul %1, %0, %cst {dimension_numbers = #tpu.dot_dimension_numbers<[1], [0], [0], [1], [0, 0, 1, 1], [], []>} : vector<64x32xbf16>, vector<32x128xbf16>, vector<64x128xf32> -> vector<64x128xf32>
    %4 = vector.broadcast %2 : vector<64x1xf32> to vector<64x128xf32>
    %5 = arith.addf %3, %4 : vector<64x128xf32>
    %cst_5 = arith.constant 0.000000e+00 : f32
    %6 = vector.broadcast %cst_5 : f32 to vector<64x128xf32>
    %7 = arith.maximumf %5, %6 : vector<64x128xf32>
    %c0_6 = arith.constant 0 : index
    %c0_7 = arith.constant 0 : index
    %8 = vector.load %arg4[%c0_6, %c0_7] : memref<32x64xbf16, #tpu.memory_space<vmem>>, vector<32x64xbf16>
    %c0_8 = arith.constant 0 : index
    %c0_9 = arith.constant 0 : index
    %9 = vector.load %arg5[%c0_8, %c0_9] : memref<32x1xf32, #tpu.memory_space<vmem>>, vector<32x1xf32>
    %10 = arith.truncf %7 : vector<64x128xf32> to vector<64x128xbf16>
    %cst_10 = arith.constant dense<0.000000e+00> : vector<32x128xf32>
    %11 = tpu.matmul %8, %10, %cst_10 {dimension_numbers = #tpu.dot_dimension_numbers<[1], [0], [0], [1], [0, 0, 1, 1], [], []>} : vector<32x64xbf16>, vector<64x128xbf16>, vector<32x128xf32> -> vector<32x128xf32>
    %12 = vector.broadcast %9 : vector<32x1xf32> to vector<32x128xf32>
    %13 = arith.addf %11, %12 : vector<32x128xf32>
    %cst_11 = arith.constant 0.000000e+00 : f32
    %14 = vector.broadcast %cst_11 : f32 to vector<32x128xf32>
    %15 = arith.maximumf %13, %14 : vector<32x128xf32>
    %c0_12 = arith.constant 0 : index
    %c0_13 = arith.constant 0 : index
    %16 = vector.load %arg6[%c0_12, %c0_13] : memref<1x32xf32, #tpu.memory_space<vmem>>, vector<1x32xf32>
    %cst_14 = arith.constant dense<0.000000e+00> : vector<1x128xf32>
    %17 = tpu.matmul %16, %15, %cst_14 {dimension_numbers = #tpu.dot_dimension_numbers<[1], [0], [0], [1], [0, 0, 1, 1], [], []>} : vector<1x32xf32>, vector<32x128xf32>, vector<1x128xf32> -> vector<1x128xf32>
    %c0_15 = arith.constant 0 : index
    %c0_16 = arith.constant 0 : index
    %18 = memref.load %arg7[%c0_15, %c0_16] : memref<1x1xf32, #tpu.memory_space<smem>>
    %19 = vector.broadcast %18 : f32 to vector<1x128xf32>
    %20 = arith.addf %17, %19 : vector<1x128xf32>
    %c0_17 = arith.constant 0 : index
    %c0_18 = arith.constant 0 : index
    %21 = vector.load %arg8[%c0_17, %c0_18] : memref<1x128xf32, #tpu.memory_space<vmem>>, vector<1x128xf32>
    tpu.vector_store %arg8[%c0_17, %c0_18], %20 {strides = array<i32>} : memref<1x128xf32, #tpu.memory_space<vmem>>, vector<1x128xf32>,
    return
  }
  func.func @transform_0(%arg0: i32) -> (i32, i32) {
    %c0_i32 = arith.constant 0 : i32
    %c0_i32_0 = arith.constant 0 : i32
    return %c0_i32, %arg0 : i32, i32
  }
  func.func @transform_1(%arg0: i32) -> (i32, i32) {
    %c0_i32 = arith.constant 0 : i32
    %c0_i32_0 = arith.constant 0 : i32
    %c0_i32_1 = arith.constant 0 : i32
    return %c0_i32, %c0_i32_0 : i32, i32
  }
  func.func @transform_2(%arg0: i32) -> (i32, i32) {
    %c0_i32 = arith.constant 0 : i32
    %c0_i32_0 = arith.constant 0 : i32
    %c0_i32_1 = arith.constant 0 : i32
    return %c0_i32, %c0_i32_0 : i32, i32
  }
  func.func @transform_3(%arg0: i32) -> (i32, i32) {
    %c0_i32 = arith.constant 0 : i32
    %c0_i32_0 = arith.constant 0 : i32
    %c0_i32_1 = arith.constant 0 : i32
    return %c0_i32, %c0_i32_0 : i32, i32
  }
  func.func @transform_4(%arg0: i32) -> (i32, i32) {
    %c0_i32 = arith.constant 0 : i32
    %c0_i32_0 = arith.constant 0 : i32
    %c0_i32_1 = arith.constant 0 : i32
    return %c0_i32, %c0_i32_0 : i32, i32
  }
  func.func @transform_5(%arg0: i32) -> (i32, i32) {
    %c0_i32 = arith.constant 0 : i32
    %c0_i32_0 = arith.constant 0 : i32
    %c0_i32_1 = arith.constant 0 : i32
    return %c0_i32, %c0_i32_0 : i32, i32
  }
  func.func @transform_6(%arg0: i32) -> (i32, i32) {
    %c0_i32 = arith.constant 0 : i32
    %c0_i32_0 = arith.constant 0 : i32
    %c0_i32_1 = arith.constant 0 : i32
    return %c0_i32, %c0_i32_0 : i32, i32
  }
  func.func @transform_7(%arg0: i32) -> (i32, i32) {
    %c0_i32 = arith.constant 0 : i32
    %c0_i32_0 = arith.constant 0 : i32
    return %c0_i32, %arg0 : i32, i32
  }
}

</mosaic_0001>

<bundles_post_ra>
// kernel: mlp_forward.1
= control target key start
LH: loop header
LB: loop body
LE: loop exit
PB: predicated region body
PF: predicated region fallthrough
CT: control target
= control target key end

     0   :  { %s1184_s0 = inlined_call_operand.vmem [shape: bf16[32,256], index: 0, kind: input, shape index: {}]   ;;  %s1185_s1 = inlined_call_operand.vmem [shape: bf16[64,32], index: 1, kind: input, shape index: {}]   ;;  %s1186_s2 = inlined_call_operand.vmem [shape: f32[64,1], index: 2, kind: input, shape index: {}]   ;;  %s1187_s3 = inlined_call_operand.vmem [shape: bf16[32,64], index: 3, kind: input, shape index: {}]   ;;  %s1188_s4 = inlined_call_operand.vmem [shape: f32[32,1], index: 4, kind: input, shape index: {}]   ;;  %s1189_s5 = inlined_call_operand.vmem [shape: f32[1,32], index: 5, kind: input, shape index: {}]   ;;  %s1190_s6 = inlined_call_operand.<no memory space> [shape: f32[1,1], index: 6, kind: input, shape index: {}]   ;;  %s1191_s7 = inlined_call_operand.hbm [shape: f32[1,256], index: 7, kind: output, shape index: {}]  }
   0x1   :  { %12 = sst [smem:[#allocation2]] %s1190_s6 }
   0x2   :  { %13 = vsyncpa [#allocation5], 0 }
   0x3   :  { %15 = vsyncpa [#allocation5 + $0x1], 0  ;;  %s1010_s26 = smov 0   ;;  %s1012_s27 = smov 0  }
   0x4   :  { %s1014_s28 = smov 0   ;;  %s1016_s29 = smov 0  }
   0x5 LB: > { %s761_s6 = sadd.s32 4294967295, %s960_s29   ;;  %s762_s30 = sadd.s32 4294967294, %s960_s29   ;;  %s960_s29 = sphi %s1016_s29, %s1197_s29   ;;  %s956_s28 = sphi %s1014_s28, %s1196_s28   ;;  %s952_s27 = sphi %s1012_s27, %s1195_s27   ;;  %s948_s26 = sphi %s1010_s26, %s1194_s26  }
   0x6   : > { %s1033_s8 = sadd.s32 1, %s960_s29   ;;  %s28_s9 = sadd.s32 1, %s956_s28 }
   0x7   : > { %s25_s10 = ssub.s32 %s960_s29, %s1033_s8  ;;  %p35_p0 = scmp.ne.s32.totalorder %s956_s28, %s952_s27 }
   0x8   : > { %p26_p1 = scmp.eq.s32.totalorder %s25_s10, 0  ;;  %p36_p2 = scmp.eq.s32.totalorder %s960_s29, 0 }
   0x9   : > { %p191_p3 = scmp.eq.s32.totalorder %s761_s6, 1  ;;  %p196_p4 = scmp.ne.s32.totalorder %s952_s27, %s948_s26 }
   0xa   : > { %s1046_s11 = scalar_select %p26_p1, %s956_s28, %s28_s9  }
   0xb   : > { %p37_p5 = por %p36_p2, %p35_p0  ;;  %p1048_p6 = por %p191_p3, %p35_p0 }
   0xc   : > { %p197_p7 = scmp.eq.s32.totalorder %s762_s30, 1  ;;  %p764_p9 = scmp.ge.s32.totalorder %s960_s29, 2 }
   0xe   : > { %p1052_p8 = por %p197_p7, %p196_p4  ;;  %231 = sbr.rel (%p764_p9) target bundleno = 28 (0x1c), region = 40 }
  0x15   : > { %234 = sbr.rel (!%p37_p5) target bundleno = 28 (0x1c), region = 44  ;;  %s236_s14 = sand.u32 (%p37_p5), 1, %s956_s28  }
  0x16   : > { %s766_s15 = sshll.u32 (%p37_p5), %s960_s29, 2  ;;  %s765_s16 = sshll.u32 (%p37_p5), %s236_s14, 4 }
  0x17   : > { %s240_s19 = scalar_lea.vmem (%p37_p5), %s1184_s0, %s766_s15  ;;  %s238_s20 = scalar_lea.vmem (%p37_p5), [#allocation3], %s765_s16 }
  0x18   : > { %v256_v0 = vld [vmem:[%s240_s19] sm:$0xf] (%p37_p5)  ;;  %v258_v1 = vld [vmem:[%s240_s19 + $0x8] sm:$0xf] (%p37_p5)  ;;  %v260_v2 = vld [vmem:[%s240_s19 + $0x10] sm:$0xf] (%p37_p5) }
  0x19   : > { %257 = vst [vmem:[%s238_s20] sm:$0xf] (%p37_p5), %v256_v0  ;;  %259 = vst [vmem:[%s238_s20 + $0x4] sm:$0xf] (%p37_p5), %v258_v1  ;;  %v262_v3 = vld [vmem:[%s240_s19 + $0x18] sm:$0xf] (%p37_p5) }
  0x1a   : > { %261 = vst [vmem:[%s238_s20 + $0x8] sm:$0xf] (%p37_p5), %v260_v2  ;;  %263 = vst [vmem:[%s238_s20 + $0xc] sm:$0xf] (%p37_p5), %v262_v3 }
  0x1c PF: > { %p767_p10 = scmp.ge.s32.totalorder %s960_s29, 1  ;;  %p293_p11 = scmp.lt.s32.totalorder %s960_s29, 3 }
  0x1e   : > { %p294_p12 = pnand %p767_p10, %p293_p11 }
  0x1f   : > { %s1067_s21 = sand.u32 (!%p294_p12), 1, %s952_s27   ;;  %v892_v4 = vld [vmem:[%s1185_s1] sm:$0xff] (!%p294_p12)   ;;  %vm423_vm0 = vcmask (!%p294_p12), 261120   ;;  %v962_v7 = vmov (!%p294_p12), 0   ;;  %v345_v9 = vld [vmem:[%s1186_s2 + $0x10] sm:$0xff] (!%p294_p12)  ;;  %v344_v10 = vld [vmem:[%s1186_s2 + $0x8] sm:$0xff] (!%p294_p12) }
  0x20   : > { %297 = sbr.rel (%p294_p12) target bundleno = 736 (0x2e0), region = 85  ;;  %s768_s24 = sshll.u32 (!%p294_p12), %s1067_s21, 4  ;;  %808 = vmatprep.mubr.msk.bf16.mxu0 (!%p294_p12), %vm423_vm0, %v892_v4  ;;  %888 = vset.pattern.permute.xlu0 (!%p294_p12), %v962_v7  ;;  %v343_v8 = vld [vmem:[%s1186_s2] sm:$0xff] (!%p294_p12)  ;;  %v893_v11 = vld [vmem:[%s1185_s1 + $0x8] sm:$0xff] (!%p294_p12)   ;;  %v346_v12 = vld [vmem:[%s1186_s2 + $0x18] sm:$0xff] (!%p294_p12)  ;;  %vm551_vm1 = vcmask (!%p294_p12), 523264  }
  0x21   : > { %s302_s25 = scalar_lea.vmem (!%p294_p12), [#allocation3], %s768_s24  ;;  %889 = vset.pattern.permute.xlu1 (!%p294_p12), %v962_v7  ;;  %353 = vperm.xlu0 (!%p294_p12), %888, %v343_v8   ;;  %v894_v13 = vld [vmem:[%s1185_s1 + $0x10] sm:$0xff] (!%p294_p12)   ;;  %v347_v14 = vld [vmem:[%s1186_s2 + $0x20] sm:$0xff] (!%p294_p12)  ;;  %v348_v15 = vld [vmem:[%s1186_s2 + $0x28] sm:$0xff] (!%p294_p12)  ;;  %v963_v61 = vmov (!%p294_p12), 0.0|0.0   ;;  %vm964_vm2 = vmmov (!%p294_p12), 0  }
  0x22   : > { %v890_v5 = vld [vmem:[%s302_s25] sm:$0xff] (!%p294_p12)   ;;  %v891_v6 = vld [vmem:[%s302_s25 + $0x8] sm:$0xff] (!%p294_p12)   ;;  %363 = vperm.xlu1 (!%p294_p12), %889, %v345_v9   ;;  %v965_v62 = vmov (!%p294_p12), 0.0   ;;  %s612_s19 = sld [smem:[#allocation2]] (!%p294_p12)  ;;  %s784_s20 = sshll.u32 (!%p294_p12), %s761_s6, 4 }
  0x23   : > { %804 = vmatprep.subr.bf16.mxu0 (!%p294_p12), %v890_v5  ;;  %v349_v16 = vld [vmem:[%s1186_s2 + $0x30] sm:$0xff] (!%p294_p12)  ;;  %v895_v17 = vld [vmem:[%s1185_s1 + $0x18] sm:$0xff] (!%p294_p12)   ;;  %v513_v19 = vld [vmem:[%s1188_s4] sm:$0xff] (!%p294_p12)  ;;  %s329_s22 = scalar_lea.vmem (!%p294_p12), [#allocation4], %s1067_s21  ;;  %s1140_s30 = scalar_lea.hbm (!%p294_p12), %s1191_s7, %s784_s20 }
  0x24   : > { %805 = vmatpush3.bf16.msra.mxu0 (!%p294_p12), %v890_v5  ;;  %v350_v18 = vld [vmem:[%s1186_s2 + $0x38] sm:$0xff] (!%p294_p12)  ;;  %v514_v20 = vld [vmem:[%s1188_s4 + $0x8] sm:$0xff] (!%p294_p12)  ;;  %v515_v21 = vld [vmem:[%s1188_s4 + $0x10] sm:$0xff] (!%p294_p12)  ;;  %s701_s23 = sshll.u32 (!%p294_p12), %s329_s22, 4  ;;  %s689_s9 = scalar_lea.sflag (!%p294_p12), [#allocation5], %s1067_s21  ;;  %s1142_s23 = int_to_ptr.vmem [resolvable:$true] %s701_s23 }
  0x25   : > { %806 = vmatprep.subr.bf16.mxu0 (!%p294_p12), %v891_v6  ;;  %358 = vperm.xlu0 (!%p294_p12), %888, %v344_v10   ;;  %v516_v22 = vld [vmem:[%s1188_s4 + $0x18] sm:$0xff] (!%p294_p12)  ;;  %v896_v23 = vld [vmem:[%s1187_s3] sm:$0xff] (!%p294_p12)   ;;  %v897_v60 = vld [vmem:[%s1187_s3 + $0x8] sm:$0xff] (!%p294_p12)   ;;  %s898_s10 = scalar_lea.vmem (!%p294_p12), %s1142_s23, 16  ;;  %s966_s6 = smov (!%p294_p12), [#allocation4]  }
  0x26   : > { %368 = vperm.xlu1 (!%p294_p12), %889, %v346_v12   ;;  %824 = vmatprep.mubr.msk.bf16.mxu1 (!%p294_p12), %vm551_vm1, %v896_v23  ;;  %p899_p13 = scmp.ne.s32.totalorder (!%p294_p12), %s1142_s23, %s898_s10  ;;  %s902_s14 = sshll.u32 (!%p294_p12), %s966_s6, 4  ;;  %s903_s14 = int_to_ptr.vmem [resolvable:$false] %s902_s14 }
  0x27   : > { %s904_s15 = scalar_lea.vmem %s903_s14, 32  ;;  %p905_p2 = scmp.lt.s32.totalorder %s1142_s23, %s903_s14 }
  0x28   : > { %807 = vmatpush3.bf16.msra.mxu0 %v891_v6  ;;  %p900_p0 = pnand %p899_p13, %p1048_p6  ;;  %p906_p3 = scmp.lt.s32.totalorder %s904_s15, %s898_s10 }
  0x29   : > { %373 = vperm.xlu0 %888, %v347_v14   ;;  %839 = vmatprep.subr.bf16.mxu0 %v963_v61 }
  0x2a   : > { %378 = vperm.xlu1 %889, %v348_v15   ;;  %p901_p1 = pneg %p900_p0  ;;  %p907_p4 = por %p906_p3, %p905_p2 }
  0x2b   : > { %809 = vmatmul.mubr.msk.bf16.vlgmr.msra.gmra.mrb[0].mxu0 %vm423_vm0, %v893_v11 }
  0x2c   : > { %812 = vmatprep.mubr.msk.bf16.mxu0 %vm423_vm0, %v894_v13  ;;  %p908_p5 = pnand %p907_p4, %p901_p1 }
  0x2d   : > { %383 = vperm.xlu0 %888, %v349_v16  }
  0x2e   : > { %388 = vperm.xlu1 %889, %v350_v18   ;;  %v613_v18 = vstv %s612_s19 }
  0x31   : > { %523 = vperm.xlu0 %888, %v513_v19  }
  0x32   : > { %528 = vperm.xlu1 %889, %v514_v20  }
  0x33   : > { %813 = vmatmul.mubr.msk.bf16.gmra.mrb[4].mxu0 %vm423_vm0, %v895_v17  ;;  %v611_v17 = vld [vmem:[%s1189_s5] sm:$0x1] }
  0x34   : > { %836 = vmatprep.mubr.msk.f32.mxu0 %vm964_vm2, %v965_v62 }
  0x35   : > { %533 = vperm.xlu0 %888, %v515_v21  }
  0x36   : > { %538 = vperm.xlu1 %889, %v516_v22  }
  0xa0   : > { %v354_v24 = vpop.permute.xlu0 %353 }
  0xa1   : > { %v364_v25 = vpop.permute.xlu1 %363 }
  0xa4   : > { %v359_v26 = vpop.permute.xlu0 %358 }
  0xa5   : > { %v369_v27 = vpop.permute.xlu1 %368 }
  0xa8   : > { %v374_v31 = vpop.permute.xlu0 %373 }
  0xa9   : > { %v379_v36 = vpop.permute.xlu1 %378 }
  0xac   : > { %v384_v43 = vpop.permute.xlu0 %383 }
  0xad   : > { %v389_v48 = vpop.permute.xlu1 %388 }
  0xb0   : > { %v524_v63 = vpop.permute.xlu0 %523 }
  0xb1   : > { %v529_v0 = vpop.permute.xlu1 %528 }
  0xb4   : > { %v534_v1 = vpop.permute.xlu0 %533 }
  0xb5   : > { %v539_v5 = vpop.permute.xlu1 %538 }
  0xfe   : > { %v810_v28 = vpop.f32.mrb[0].mxu0 }
  0xff   : > { %v479_v29 = vadd.f32 %v810_v28, %v364_v25  ;;  %v470_v30 = vpop.f32.mrb[1].mxu0 }
 0x100   : > { %v471_v32 = vadd.f32 %v470_v30, %v354_v24  ;;  %v811_v33 = vpop.f32.mrb[2].mxu0 }
 0x101   : > { %v482_v34 = vadd.f32 %v811_v33, %v369_v27  ;;  %v473_v35 = vpop.f32.mrb[3].mxu0  ;;  %v503_v38 = vmax.f32 %v479_v29, 0.0 }
 0x102   : > { %v474_v37 = vadd.f32 %v473_v35, %v359_v26  ;;  %v501_v40 = vmax.f32 %v471_v32, 0.0 }
 0x103   : > { %v504_v39 = vmax.f32 %v482_v34, 0.0 }
 0x104   : > { %v502_v41 = vmax.f32 %v474_v37, 0.0 }
 0x105   : > { %v518_v42 = vpack.c.bf16 %v504_v39, %v503_v38 }
 0x106   : > { %v814_v44 = vpop.f32.mrb[4].mxu0  ;;  %v517_v45 = vpack.c.bf16 %v502_v41, %v501_v40 }
 0x107   : > { %v495_v46 = vadd.f32 %v814_v44, %v384_v43  ;;  %v486_v47 = vpop.f32.mrb[5].mxu0 }
 0x108   : > { %v487_v49 = vadd.f32 %v486_v47, %v374_v31  ;;  %v815_v50 = vpop.f32.mrb[6].mxu0  ;;  %816 = vmatprep.subr.bf16.mxu1 %v517_v45 }
 0x109   : > { %v498_v51 = vadd.f32 %v815_v50, %v389_v48  ;;  %v489_v52 = vpop.f32.mrb[7].mxu0  ;;  %817 = vmatpush3.bf16.msra.mxu1 %v517_v45  ;;  %v507_v54 = vmax.f32 %v495_v46, 0.0 }
 0x10a   : > { %v490_v53 = vadd.f32 %v489_v52, %v379_v36  ;;  %818 = vmatprep.subr.bf16.mxu1 %v518_v42  ;;  %v505_v56 = vmax.f32 %v487_v49, 0.0 }
 0x10b   : > { %v508_v55 = vmax.f32 %v498_v51, 0.0 }
 0x10c   : > { %v506_v57 = vmax.f32 %v490_v53, 0.0 }
 0x10d   : > { %v520_v58 = vpack.c.bf16 %v508_v55, %v507_v54  ;;  %819 = vmatpush3.bf16.msra.mxu1 %v518_v42 }
 0x10e   : > { %v519_v59 = vpack.c.bf16 %v506_v57, %v505_v56 }
 0x110   : > { %820 = vmatprep.subr.bf16.mxu1 %v519_v59 }
 0x111   : > { %821 = vmatpush3.bf16.msra.mxu1 %v519_v59 }
 0x112   : > { %822 = vmatprep.subr.bf16.mxu1 %v520_v58 }
 0x115   : > { %823 = vmatpush3.bf16.msra.mxu1 %v520_v58 }
 0x118   : > { %825 = vmatmul.mubr.msk.bf16.vlgmr.msra.gmra.mrb[0].mxu1 %vm551_vm1, %v897_v60 }
 0x1eb   : > { %v826_v2 = vpop.f32.mrb[0].mxu1 }
 0x1ec   : > { %v601_v3 = vadd.f32 %v826_v2, %v534_v1  ;;  %v592_v4 = vpop.f32.mrb[1].mxu1 }
 0x1ed   : > { %v593_v6 = vadd.f32 %v592_v4, %v524_v63  ;;  %v827_v7 = vpop.f32.mrb[2].mxu1 }
 0x1ee   : > { %v604_v8 = vadd.f32 %v827_v7, %v539_v5  ;;  %v595_v9 = vpop.f32.mrb[3].mxu1  ;;  %v609_v11 = vmax.f32 %v601_v3, 0.0 }
 0x1ef   : > { %v596_v10 = vadd.f32 %v595_v9, %v529_v0  ;;  %v607_v13 = vmax.f32 %v593_v6, 0.0 }
 0x1f0   : > { %v610_v12 = vmax.f32 %v604_v8, 0.0 }
 0x1f1   : > { %v608_v14 = vmax.f32 %v596_v10, 0.0 }
 0x1f2   : > { %v843_v15 = vpack.c.bf16 %v610_v12, %v609_v11 }
 0x1f3   : > { %v840_v16 = vpack.c.bf16 %v608_v14, %v607_v13 }
 0x1f5   : > { %841 = vmatpush3.bf16.msra.mxu0 %v840_v16 }
 0x1f6   : > { %842 = vmatprep.subr.bf16.mxu0 %v963_v61 }
 0x1f9   : > { %844 = vmatpush3.bf16.msra.mxu0 %v843_v15 }
 0x1fc   : > { %837 = vmatmul.mubr.msk.f32.vlgmr.msra.gmra.mrb[8].mxu0 %vm423_vm0, %v611_v17 }
 0x2cf   : > { %v683_v19 = vpop.f32.mrb[8].mxu0 }
 0x2d0   : > { %v684_v20 = vadd.f32 %v683_v19, %v613_v18  ;;  %v838_v21 = vpop.f32.mrb[9].mxu0 }
 0x2d2   : > { %687 = vst [vmem:[%s329_s22] sm:$0x1] %v684_v20 }
 0x2d3   : > { %911 = shalt.err (!%p908_p5)
}
 0x2d4   : > { %s912_s21 = scalar_lea.hbm %s1140_s30, 16  ;;  %s916_s18 = scalar_lea.hbm %s1191_s7, 32 }
 0x2d5   : > { %p913_p7 = scmp.ne.s32.totalorder %s1140_s30, %s912_s21  ;;  %p917_p12 = scmp.lt.u32.totalorder %s1140_s30, %s1191_s7 }
 0x2d6   : > { %p918_p13 = scmp.lt.u32.totalorder %s916_s18, %s912_s21  ;;  %p920_p1 = scmp.lt.u32.totalorder %s912_s21, %s1140_s30 }
 0x2d7   : > { %p914_p10 = pnand %p913_p7, %p1048_p6 }
 0x2d8   : > { %p919_p0 = por %p918_p13, %p917_p12 }
 0x2d9   : > { %p915_p11 = pneg %p914_p10 }
 0x2da   : > { %p921_p2 = por %p920_p1, %p919_p0 }
 0x2dc   : > { %p922_p3 = pnand %p921_p2, %p915_p11 }
 0x2de   : > { %925 = shalt.err (!%p922_p3)
}
 0x2df   : > { %845 = dma.vmem_to_hbm [thread:$0]  (%p1048_p6), %s1142_s23, 16, %s1140_s30, %s689_s9  }
 0x2e0 PF: > { %s713_s22 = sand.u32 1, %s948_s26   ;;  %p848_p4 = pnand %p764_p9, %p1052_p8 }
 0x2e1   : > { %s714_s24 = scalar_lea.sflag [#allocation5], %s713_s22 }
 0x2e2   : > { %943 = dma.done.wait (!%p848_p4), %s714_s24, 16  }
 0x2e3   : > { %945 = vsyncadd (!%p848_p4), %s714_s24, 4294967280  ;;  %p18_p5 = scmp.ge.s32.totalorder %s1033_s8, 4   ;;  %s1194_s26 = smov %s952_s27 }
 0x2e4   : > { %s1195_s27 = smov %s956_s28  ;;  %s1196_s28 = smov %s1046_s11 }
 0x2e5   : > { %s1197_s29 = smov %s1033_s8  ;;  %20 = sbr.rel (!%p18_p5) target bundleno = 5 (0x5), region = 129 }
 0x2ec   :  { %718 = vsyncpa [#allocation5], 1 }
 0x2ed   :  { %720 = vsyncpa [#allocation5 + $0x1], 1 }

// kernel: mlp_forward.1
= control target key start
LH: loop header
LB: loop body
LE: loop exit
PB: predicated region body
PF: predicated region fallthrough
CT: control target
= control target key end

     0   :  { %s1184_s0 = inlined_call_operand.vmem [shape: bf16[32,256], index: 0, kind: input, shape index: {}]   ;;  %s1185_s1 = inlined_call_operand.vmem [shape: bf16[64,32], index: 1, kind: input, shape index: {}]   ;;  %s1186_s2 = inlined_call_operand.vmem [shape: f32[64,1], index: 2, kind: input, shape index: {}]   ;;  %s1187_s3 = inlined_call_operand.vmem [shape: bf16[32,64], index: 3, kind: input, shape index: {}]   ;;  %s1188_s4 = inlined_call_operand.vmem [shape: f32[32,1], index: 4, kind: input, shape index: {}]   ;;  %s1189_s5 = inlined_call_operand.vmem [shape: f32[1,32], index: 5, kind: input, shape index: {}]   ;;  %s1190_s6 = inlined_call_operand.<no memory space> [shape: f32[1,1], index: 6, kind: input, shape index: {}]   ;;  %s1191_s7 = inlined_call_operand.hbm [shape: f32[1,256], index: 7, kind: output, shape index: {}]  }
   0x1   :  { %12 = sst [smem:[#allocation2]] %s1190_s6 }
   0x2   :  { %13 = vsyncpa [#allocation5], 0 }
   0x3   :  { %15 = vsyncpa [#allocation5 + $0x1], 0  ;;  %s1010_s26 = smov 0   ;;  %s1012_s27 = smov 0  }
   0x4   :  { %s1014_s28 = smov 0   ;;  %s1016_s29 = smov 0  }
   0x5 LB: > { %s761_s6 = sadd.s32 4294967295, %s960_s29   ;;  %s762_s30 = sadd.s32 4294967294, %s960_s29   ;;  %s960_s29 = sphi %s1016_s29, %s1197_s29   ;;  %s956_s28 = sphi %s1014_s28, %s1196_s28   ;;  %s952_s27 = sphi %s1012_s27, %s1195_s27   ;;  %s948_s26 = sphi %s1010_s26, %s1194_s26  }
   0x6   : > { %s1033_s8 = sadd.s32 1, %s960_s29   ;;  %s28_s9 = sadd.s32 1, %s956_s28 }
   0x7   : > { %s25_s10 = ssub.s32 %s960_s29, %s1033_s8  ;;  %p35_p0 = scmp.ne.s32.totalorder %s956_s28, %s952_s27 }
   0x8   : > { %p26_p1 = scmp.eq.s32.totalorder %s25_s10, 0  ;;  %p36_p2 = scmp.eq.s32.totalorder %s960_s29, 0 }
   0x9   : > { %p191_p3 = scmp.eq.s32.totalorder %s761_s6, 1  ;;  %p196_p4 = scmp.ne.s32.totalorder %s952_s27, %s948_s26 }
   0xa   : > { %s1046_s11 = scalar_select %p26_p1, %s956_s28, %s28_s9  }
   0xb   : > { %p37_p5 = por %p36_p2, %p35_p0  ;;  %p1048_p6 = por %p191_p3, %p35_p0 }
   0xc   : > { %p197_p7 = scmp.eq.s32.totalorder %s762_s30, 1  ;;  %p764_p9 = scmp.ge.s32.totalorder %s960_s29, 2 }
   0xe   : > { %p1052_p8 = por %p197_p7, %p196_p4  ;;  %231 = sbr.rel (%p764_p9) target bundleno = 28 (0x1c), region = 40 }
  0x15   : > { %234 = sbr.rel (!%p37_p5) target bundleno = 28 (0x1c), region = 44  ;;  %s236_s14 = sand.u32 (%p37_p5), 1, %s956_s28  }
  0x16   : > { %s766_s15 = sshll.u32 (%p37_p5), %s960_s29, 2  ;;  %s765_s16 = sshll.u32 (%p37_p5), %s236_s14, 4 }
  0x17   : > { %s240_s19 = scalar_lea.vmem (%p37_p5), %s1184_s0, %s766_s15  ;;  %s238_s20 = scalar_lea.vmem (%p37_p5), [#allocation3], %s765_s16 }
  0x18   : > { %v256_v0 = vld [vmem:[%s240_s19] sm:$0xf] (%p37_p5)  ;;  %v258_v1 = vld [vmem:[%s240_s19 + $0x8] sm:$0xf] (%p37_p5)  ;;  %v260_v2 = vld [vmem:[%s240_s19 + $0x10] sm:$0xf] (%p37_p5) }
  0x19   : > { %257 = vst [vmem:[%s238_s20] sm:$0xf] (%p37_p5), %v256_v0  ;;  %259 = vst [vmem:[%s238_s20 + $0x4] sm:$0xf] (%p37_p5), %v258_v1  ;;  %v262_v3 = vld [vmem:[%s240_s19 + $0x18] sm:$0xf] (%p37_p5) }
  0x1a   : > { %261 = vst [vmem:[%s238_s20 + $0x8] sm:$0xf] (%p37_p5), %v260_v2  ;;  %263 = vst [vmem:[%s238_s20 + $0xc] sm:$0xf] (%p37_p5), %v262_v3 }
  0x1c PF: > { %p767_p10 = scmp.ge.s32.totalorder %s960_s29, 1  ;;  %p293_p11 = scmp.lt.s32.totalorder %s960_s29, 3 }
  0x1e   : > { %p294_p12 = pnand %p767_p10, %p293_p11 }
  0x1f   : > { %s1067_s21 = sand.u32 (!%p294_p12), 1, %s952_s27   ;;  %v892_v4 = vld [vmem:[%s1185_s1] sm:$0xff] (!%p294_p12)   ;;  %vm423_vm0 = vcmask (!%p294_p12), 261120   ;;  %v962_v7 = vmov (!%p294_p12), 0   ;;  %v345_v9 = vld [vmem:[%s1186_s2 + $0x10] sm:$0xff] (!%p294_p12)  ;;  %v344_v10 = vld [vmem:[%s1186_s2 + $0x8] sm:$0xff] (!%p294_p12) }
  0x20   : > { %297 = sbr.rel (%p294_p12) target bundleno = 736 (0x2e0), region = 85  ;;  %s768_s24 = sshll.u32 (!%p294_p12), %s1067_s21, 4  ;;  %808 = vmatprep.mubr.msk.bf16.mxu0 (!%p294_p12), %vm423_vm0, %v892_v4  ;;  %888 = vset.pattern.permute.xlu0 (!%p294_p12), %v962_v7  ;;  %v343_v8 = vld [vmem:[%s1186_s2] sm:$0xff] (!%p294_p12)  ;;  %v893_v11 = vld [vmem:[%s1185_s1 + $0x8] sm:$0xff] (!%p294_p12)   ;;  %v346_v12 = vld [vmem:[%s1186_s2 + $0x18] sm:$0xff] (!%p294_p12)  ;;  %vm551_vm1 = vcmask (!%p294_p12), 523264  }
  0x21   : > { %s302_s25 = scalar_lea.vmem (!%p294_p12), [#allocation3], %s768_s24  ;;  %889 = vset.pattern.permute.xlu1 (!%p294_p12), %v962_v7  ;;  %353 = vperm.xlu0 (!%p294_p12), %888, %v343_v8   ;;  %v894_v13 = vld [vmem:[%s1185_s1 + $0x10] sm:$0xff] (!%p294_p12)   ;;  %v347_v14 = vld [vmem:[%s1186_s2 + $0x20] sm:$0xff] (!%p294_p12)  ;;  %v348_v15 = vld [vmem:[%s1186_s2 + $0x28] sm:$0xff] (!%p294_p12)  ;;  %v963_v61 = vmov (!%p294_p12), 0.0|0.0   ;;  %vm964_vm2 = vmmov (!%p294_p12), 0  }
  0x22   : > { %v890_v5 = vld [vmem:[%s302_s25] sm:$0xff] (!%p294_p12)   ;;  %v891_v6 = vld [vmem:[%s302_s25 + $0x8] sm:$0xff] (!%p294_p12)   ;;  %363 = vperm.xlu1 (!%p294_p12), %889, %v345_v9   ;;  %v965_v62 = vmov (!%p294_p12), 0.0   ;;  %s612_s19 = sld [smem:[#allocation2]] (!%p294_p12)  ;;  %s784_s20 = sshll.u32 (!%p294_p12), %s761_s6, 4 }
  0x23   : > { %804 = vmatprep.subr.bf16.mxu0 (!%p294_p12), %v890_v5  ;;  %v349_v16 = vld [vmem:[%s1186_s2 + $0x30] sm:$0xff] (!%p294_p12)  ;;  %v895_v17 = vld [vmem:[%s1185_s1 + $0x18] sm:$0xff] (!%p294_p12)   ;;  %v513_v19 = vld [vmem:[%s1188_s4] sm:$0xff] (!%p294_p12)  ;;  %s329_s22 = scalar_lea.vmem (!%p294_p12), [#allocation4], %s1067_s21  ;;  %s1140_s30 = scalar_lea.hbm (!%p294_p12), %s1191_s7, %s784_s20 }
  0x24   : > { %805 = vmatpush3.bf16.msra.mxu0 (!%p294_p12), %v890_v5  ;;  %v350_v18 = vld [vmem:[%s1186_s2 + $0x38] sm:$0xff] (!%p294_p12)  ;;  %v514_v20 = vld [vmem:[%s1188_s4 + $0x8] sm:$0xff] (!%p294_p12)  ;;  %v515_v21 = vld [vmem:[%s1188_s4 + $0x10] sm:$0xff] (!%p294_p12)  ;;  %s701_s23 = sshll.u32 (!%p294_p12), %s329_s22, 4  ;;  %s689_s9 = scalar_lea.sflag (!%p294_p12), [#allocation5], %s1067_s21  ;;  %s1142_s23 = int_to_ptr.vmem [resolvable:$true] %s701_s23 }
  0x25   : > { %806 = vmatprep.subr.bf16.mxu0 (!%p294_p12), %v891_v6  ;;  %358 = vperm.xlu0 (!%p294_p12), %888, %v344_v10   ;;  %v516_v22 = vld [vmem:[%s1188_s4 + $0x18] sm:$0xff] (!%p294_p12)  ;;  %v896_v23 = vld [vmem:[%s1187_s3] sm:$0xff] (!%p294_p12)   ;;  %v897_v60 = vld [vmem:[%s1187_s3 + $0x8] sm:$0xff] (!%p294_p12)   ;;  %s898_s10 = scalar_lea.vmem (!%p294_p12), %s1142_s23, 16  ;;  %s966_s6 = smov (!%p294_p12), [#allocation4]  }
  0x26   : > { %368 = vperm.xlu1 (!%p294_p12), %889, %v346_v12   ;;  %824 = vmatprep.mubr.msk.bf16.mxu1 (!%p294_p12), %vm551_vm1, %v896_v23  ;;  %p899_p13 = scmp.ne.s32.totalorder (!%p294_p12), %s1142_s23, %s898_s10  ;;  %s902_s14 = sshll.u32 (!%p294_p12), %s966_s6, 4  ;;  %s903_s14 = int_to_ptr.vmem [resolvable:$false] %s902_s14 }
  0x27   : > { %s904_s15 = scalar_lea.vmem %s903_s14, 32  ;;  %p905_p2 = scmp.lt.s32.totalorder %s1142_s23, %s903_s14 }
  0x28   : > { %807 = vmatpush3.bf16.msra.mxu0 %v891_v6  ;;  %p900_p0 = pnand %p899_p13, %p1048_p6  ;;  %p906_p3 = scmp.lt.s32.totalorder %s904_s15, %s898_s10 }
  0x29   : > { %373 = vperm.xlu0 %888, %v347_v14   ;;  %839 = vmatprep.subr.bf16.mxu0 %v963_v61 }
  0x2a   : > { %378 = vperm.xlu1 %889, %v348_v15   ;;  %p901_p1 = pneg %p900_p0  ;;  %p907_p4 = por %p906_p3, %p905_p2 }
  0x2b   : > { %809 = vmatmul.mubr.msk.bf16.vlgmr.msra.gmra.mrb[0].mxu0 %vm423_vm0, %v893_v11 }
  0x2c   : > { %812 = vmatprep.mubr.msk.bf16.mxu0 %vm423_vm0, %v894_v13  ;;  %p908_p5 = pnand %p907_p4, %p901_p1 }
  0x2d   : > { %383 = vperm.xlu0 %888, %v349_v16  }
  0x2e   : > { %388 = vperm.xlu1 %889, %v350_v18   ;;  %v613_v18 = vstv %s612_s19 }
  0x31   : > { %523 = vperm.xlu0 %888, %v513_v19  }
  0x32   : > { %528 = vperm.xlu1 %889, %v514_v20  }
  0x33   : > { %813 = vmatmul.mubr.msk.bf16.gmra.mrb[4].mxu0 %vm423_vm0, %v895_v17  ;;  %v611_v17 = vld [vmem:[%s1189_s5] sm:$0x1] }
  0x34   : > { %836 = vmatprep.mubr.msk.f32.mxu0 %vm964_vm2, %v965_v62 }
  0x35   : > { %533 = vperm.xlu0 %888, %v515_v21  }
  0x36   : > { %538 = vperm.xlu1 %889, %v516_v22  }
  0xa0   : > { %v354_v24 = vpop.permute.xlu0 %353 }
  0xa1   : > { %v364_v25 = vpop.permute.xlu1 %363 }
  0xa4   : > { %v359_v26 = vpop.permute.xlu0 %358 }
  0xa5   : > { %v369_v27 = vpop.permute.xlu1 %368 }
  0xa8   : > { %v374_v31 = vpop.permute.xlu0 %373 }
  0xa9   : > { %v379_v36 = vpop.permute.xlu1 %378 }
  0xac   : > { %v384_v43 = vpop.permute.xlu0 %383 }
  0xad   : > { %v389_v48 = vpop.permute.xlu1 %388 }
  0xb0   : > { %v524_v63 = vpop.permute.xlu0 %523 }
  0xb1   : > { %v529_v0 = vpop.permute.xlu1 %528 }
  0xb4   : > { %v534_v1 = vpop.permute.xlu0 %533 }
  0xb5   : > { %v539_v5 = vpop.permute.xlu1 %538 }
  0xfe   : > { %v810_v28 = vpop.f32.mrb[0].mxu0 }
  0xff   : > { %v479_v29 = vadd.f32 %v810_v28, %v364_v25  ;;  %v470_v30 = vpop.f32.mrb[1].mxu0 }
 0x100   : > { %v471_v32 = vadd.f32 %v470_v30, %v354_v24  ;;  %v811_v33 = vpop.f32.mrb[2].mxu0 }
 0x101   : > { %v482_v34 = vadd.f32 %v811_v33, %v369_v27  ;;  %v473_v35 = vpop.f32.mrb[3].mxu0  ;;  %v503_v38 = vmax.f32 %v479_v29, 0.0 }
 0x102   : > { %v474_v37 = vadd.f32 %v473_v35, %v359_v26  ;;  %v501_v40 = vmax.f32 %v471_v32, 0.0 }
 0x103   : > { %v504_v39 = vmax.f32 %v482_v34, 0.0 }
 0x104   : > { %v502_v41 = vmax.f32 %v474_v37, 0.0 }
 0x105   : > { %v518_v42 = vpack.c.bf16 %v504_v39, %v503_v38 }
 0x106   : > { %v814_v44 = vpop.f32.mrb[4].mxu0  ;;  %v517_v45 = vpack.c.bf16 %v502_v41, %v501_v40 }
 0x107   : > { %v495_v46 = vadd.f32 %v814_v44, %v384_v43  ;;  %v486_v47 = vpop.f32.mrb[5].mxu0 }
 0x108   : > { %v487_v49 = vadd.f32 %v486_v47, %v374_v31  ;;  %v815_v50 = vpop.f32.mrb[6].mxu0  ;;  %816 = vmatprep.subr.bf16.mxu1 %v517_v45 }
 0x109   : > { %v498_v51 = vadd.f32 %v815_v50, %v389_v48  ;;  %v489_v52 = vpop.f32.mrb[7].mxu0  ;;  %817 = vmatpush3.bf16.msra.mxu1 %v517_v45  ;;  %v507_v54 = vmax.f32 %v495_v46, 0.0 }
 0x10a   : > { %v490_v53 = vadd.f32 %v489_v52, %v379_v36  ;;  %818 = vmatprep.subr.bf16.mxu1 %v518_v42  ;;  %v505_v56 = vmax.f32 %v487_v49, 0.0 }
 0x10b   : > { %v508_v55 = vmax.f32 %v498_v51, 0.0 }
 0x10c   : > { %v506_v57 = vmax.f32 %v490_v53, 0.0 }
 0x10d   : > { %v520_v58 = vpack.c.bf16 %v508_v55, %v507_v54  ;;  %819 = vmatpush3.bf16.msra.mxu1 %v518_v42 }
 0x10e   : > { %v519_v59 = vpack.c.bf16 %v506_v57, %v505_v56 }
 0x110   : > { %820 = vmatprep.subr.bf16.mxu1 %v519_v59 }
 0x111   : > { %821 = vmatpush3.bf16.msra.mxu1 %v519_v59 }
 0x112   : > { %822 = vmatprep.subr.bf16.mxu1 %v520_v58 }
 0x115   : > { %823 = vmatpush3.bf16.msra.mxu1 %v520_v58 }
 0x118   : > { %825 = vmatmul.mubr.msk.bf16.vlgmr.msra.gmra.mrb[0].mxu1 %vm551_vm1, %v897_v60 }
 0x1eb   : > { %v826_v2 = vpop.f32.mrb[0].mxu1 }
 0x1ec   : > { %v601_v3 = vadd.f32 %v826_v2, %v534_v1  ;;  %v592_v4 = vpop.f32.mrb[1].mxu1 }
 0x1ed   : > { %v593_v6 = vadd.f32 %v592_v4, %v524_v63  ;;  %v827_v7 = vpop.f32.mrb[2].mxu1 }
 0x1ee   : > { %v604_v8 = vadd.f32 %v827_v7, %v539_v5  ;;  %v595_v9 = vpop.f32.mrb[3].mxu1  ;;  %v609_v11 = vmax.f32 %v601_v3, 0.0 }
 0x1ef   : > { %v596_v10 = vadd.f32 %v595_v9, %v529_v0  ;;  %v607_v13 = vmax.f32 %v593_v6, 0.0 }
 0x1f0   : > { %v610_v12 = vmax.f32 %v604_v8, 0.0 }
 0x1f1   : > { %v608_v14 = vmax.f32 %v596_v10, 0.0 }
 0x1f2   : > { %v843_v15 = vpack.c.bf16 %v610_v12, %v609_v11 }
 0x1f3   : > { %v840_v16 = vpack.c.bf16 %v608_v14, %v607_v13 }
 0x1f5   : > { %841 = vmatpush3.bf16.msra.mxu0 %v840_v16 }
 0x1f6   : > { %842 = vmatprep.subr.bf16.mxu0 %v963_v61 }
 0x1f9   : > { %844 = vmatpush3.bf16.msra.mxu0 %v843_v15 }
 0x1fc   : > { %837 = vmatmul.mubr.msk.f32.vlgmr.msra.gmra.mrb[8].mxu0 %vm423_vm0, %v611_v17 }
 0x2cf   : > { %v683_v19 = vpop.f32.mrb[8].mxu0 }
 0x2d0   : > { %v684_v20 = vadd.f32 %v683_v19, %v613_v18  ;;  %v838_v21 = vpop.f32.mrb[9].mxu0 }
 0x2d2   : > { %687 = vst [vmem:[%s329_s22] sm:$0x1] %v684_v20 }
 0x2d3   : > { %911 = shalt.err (!%p908_p5)
}
 0x2d4   : > { %s912_s21 = scalar_lea.hbm %s1140_s30, 16  ;;  %s916_s18 = scalar_lea.hbm %s1191_s7, 32 }
 0x2d5   : > { %p913_p7 = scmp.ne.s32.totalorder %s1140_s30, %s912_s21  ;;  %p917_p12 = scmp.lt.u32.totalorder %s1140_s30, %s1191_s7 }
 0x2d6   : > { %p918_p13 = scmp.lt.u32.totalorder %s916_s18, %s912_s21  ;;  %p920_p1 = scmp.lt.u32.totalorder %s912_s21, %s1140_s30 }
 0x2d7   : > { %p914_p10 = pnand %p913_p7, %p1048_p6 }
 0x2d8   : > { %p919_p0 = por %p918_p13, %p917_p12 }
 0x2d9   : > { %p915_p11 = pneg %p914_p10 }
 0x2da   : > { %p921_p2 = por %p920_p1, %p919_p0 }
 0x2dc   : > { %p922_p3 = pnand %p921_p2, %p915_p11 }
 0x2de   : > { %925 = shalt.err (!%p922_p3)
}
 0x2df   : > { %845 = dma.vmem_to_hbm [thread:$0]  (%p1048_p6), %s1142_s23, 16, %s1140_s30, %s689_s9  }
 0x2e0 PF: > { %s713_s22 = sand.u32 1, %s948_s26   ;;  %p848_p4 = pnand %p764_p9, %p1052_p8 }
 0x2e1   : > { %s714_s24 = scalar_lea.sflag [#allocation5], %s713_s22 }
 0x2e2   : > { %943 = dma.done.wait (!%p848_p4), %s714_s24, 16  }
 0x2e3   : > { %945 = vsyncadd (!%p848_p4), %s714_s24, 4294967280  ;;  %p18_p5 = scmp.ge.s32.totalorder %s1033_s8, 4   ;;  %s1194_s26 = smov %s952_s27 }
 0x2e4   : > { %s1195_s27 = smov %s956_s28  ;;  %s1196_s28 = smov %s1046_s11 }
 0x2e5   : > { %s1197_s29 = smov %s1033_s8  ;;  %20 = sbr.rel (!%p18_p5) target bundleno = 5 (0x5), region = 129 }
 0x2ec   :  { %718 = vsyncpa [#allocation5], 1 }
 0x2ed   :  { %720 = vsyncpa [#allocation5 + $0x1], 1 }

</bundles_post_ra>
